<compile_context>
chip_gen: v5e
topology: v5e:2x2
jax: 0.10.0
libtpu: 0.0.40
codegen_flags: <defaults>
</compile_context>

<pallas_src>
import jax
import jax.numpy as jnp
from jax.experimental import pallas as pl
from jax.experimental.pallas import tpu as pltpu


def gcn_kernel(mask_ref, feat_ref, self_ref, ws_ref, wn_ref, out_ref, acc_ref):
    """Grid = (B tiles [parallel], N tiles [reduction])."""
    n = pl.program_id(1)
    n_last = pl.num_programs(1) - 1

    @pl.when(n == 0)
    def _():
        # Self-feature contribution of both encoder heads, written once per B
        # tile into the resident output block (f32).  Overlaps with the DMA of
        # the next (mask, feat) tiles instead of piling onto the epilogue.
        out_ref[...] = jnp.dot(self_ref[...], ws_ref[...],
                               preferred_element_type=jnp.float32)
        acc_ref[...] = jnp.zeros_like(acc_ref)

    # MeanAggregator partial sum: (tb, tn) @ (tn, D) accumulated in f32.
    acc_ref[...] += jnp.dot(mask_ref[...], feat_ref[...],
                            preferred_element_type=jnp.float32)

    @pl.when(n == n_last)
    def _():
        neigh = acc_ref[...].astype(wn_ref.dtype)            # (tb, D) bf16
        pre = out_ref[...] + jnp.dot(neigh, wn_ref[...],
                                     preferred_element_type=jnp.float32)
        out_ref[...] = jnp.maximum(pre, 0.0)


def gcn_forward(agg_mask, feat_data, nodes, w1, w2, *, tb=8, tn=128):
    """Fused GCN forward. Returns (h_rx, h_rc), each (OUT, B)."""
    B, N = agg_mask.shape
    D = feat_data.shape[1]
    OUT = w1.shape[0]

    # Pad batch / node axes up to the tile sizes (zeros contribute nothing).
    Bp = -(-B // tb) * tb
    Np = -(-N // tn) * tn

    # JAX glue: feature lookup for the batch (the `self.features(nodes)` call).
    self_feats = jnp.take(feat_data, nodes, axis=0)

    # bf16 on the HBM-bound operands; kernel accumulates in f32.
    mask_bf = jnp.zeros((Bp, Np), jnp.bfloat16).at[:B, :N].set(
        agg_mask.astype(jnp.bfloat16))
    feat_bf = jnp.zeros((Np, D), jnp.bfloat16).at[:N, :].set(
        feat_data.astype(jnp.bfloat16))
    self_bf = jnp.zeros((Bp, D), jnp.bfloat16).at[:B, :].set(
        self_feats.astype(jnp.bfloat16))

    # One-time wrapper-side weight prep: split self/neigh halves, transpose to
    # (K, N) layout, stack the two encoder heads along the output (lane) dim.
    ws = jnp.concatenate([w1[:, :D].T, w2[:, :D].T], axis=1).astype(jnp.bfloat16)
    wn = jnp.concatenate([w1[:, D:].T, w2[:, D:].T], axis=1).astype(jnp.bfloat16)

    grid = (Bp // tb, Np // tn)
    h = pl.pallas_call(
        gcn_kernel,
        out_shape=jax.ShapeDtypeStruct((Bp, 2 * OUT), jnp.float32),
        grid_spec=pltpu.PrefetchScalarGridSpec(
            num_scalar_prefetch=0,
            grid=grid,
            in_specs=[
                pl.BlockSpec((tb, tn), lambda b, n: (b, n)),        # agg_mask
                pl.BlockSpec((tn, D), lambda b, n: (n, 0)),         # feat_data
                pl.BlockSpec((tb, D), lambda b, n: (b, 0)),         # self feats
                pl.BlockSpec((D, 2 * OUT), lambda b, n: (0, 0)),    # ws (resident)
                pl.BlockSpec((D, 2 * OUT), lambda b, n: (0, 0)),    # wn (resident)
            ],
            out_specs=pl.BlockSpec((tb, 2 * OUT), lambda b, n: (b, 0)),
            scratch_shapes=[pltpu.VMEM((tb, D), jnp.float32)],      # neigh acc
        ),
        compiler_params=pltpu.CompilerParams(
            dimension_semantics=("parallel", "arbitrary"),
            vmem_limit_bytes=32 * 1024 * 1024,
        ),
    )(mask_bf, feat_bf, self_bf, ws, wn)

    h = h[:B]                     # strip batch padding
    # (OUT, B) views to match the PyTorch Encoder output convention.
    h_rx = h[:, :OUT].T
    h_rc = h[:, OUT:].T
    return h_rx, h_rc


def reference_forward(agg_mask, feat_data, nodes, w1, w2):
    """Pure-JAX f32 reference mirroring the PyTorch module."""
    self_feats = feat_data[nodes]
    neigh = agg_mask @ feat_data
    combined = jnp.concatenate([self_feats, neigh], axis=1)   # (B, 2D)
    h1 = jnp.maximum(w1 @ combined.T, 0.0)
    h2 = jnp.maximum(w2 @ combined.T, 0.0)
    return h1, h2


if __name__ == "__main__":
    key = jax.random.PRNGKey(0)
    # total nodes, feature dim, gcn_out_dim, batch.
    # OUT=64 -> the stacked output slab is (B, 128): lane-dense, unmasked vst.
    N, D, OUT, B = 256, 32, 64, 16
    tb, tn = 8, 128

    k_feat, k_adj, k_w1, k_w2, k_nodes = jax.random.split(key, 5)

    # feat_data (the lookup table behind `self.features`)
    feat_data = jax.random.normal(k_feat, (N, D), dtype=jnp.float32)

    # batch of node ids
    nodes = jax.random.permutation(k_nodes, N)[:B]

    # adj_lists -> dense mean-aggregation mask: random adjacency + self-loop on
    # the actual batch node id (deg >= 1), rows normalized to 1/deg
    # (MeanAggregator semantics).
    adj = (jax.random.uniform(k_adj, (B, N)) < 0.25).astype(jnp.float32)
    adj = adj.at[jnp.arange(B), nodes].set(1.0)
    deg = jnp.sum(adj, axis=1, keepdims=True)
    agg_mask = adj / deg

    # Encoder weights: (embed_dim, 2*feat_dim), xavier-uniform-style init
    bound = (6.0 / (OUT + 2 * D)) ** 0.5
    w1 = jax.random.uniform(k_w1, (OUT, 2 * D), minval=-bound, maxval=bound,
                            dtype=jnp.float32)
    w2 = jax.random.uniform(k_w2, (OUT, 2 * D), minval=-bound, maxval=bound,
                            dtype=jnp.float32)

    h_rx, h_rc = gcn_forward(agg_mask, feat_data, nodes, w1, w2, tb=tb, tn=tn)
    jax.block_until_ready((h_rx, h_rc))

    ref_rx, ref_rc = reference_forward(agg_mask, feat_data, nodes, w1, w2)
    assert h_rx.shape == (OUT, B) and h_rc.shape == (OUT, B)
    # bf16 inputs / f32 accumulation vs full-f32 reference -> relaxed tolerance.
    assert jnp.allclose(h_rx, ref_rx, atol=3e-2, rtol=3e-2)
    assert jnp.allclose(h_rc, ref_rc, atol=3e-2, rtol=3e-2)

    print("KERNEL_OK")
</pallas_src>

<mosaic_0001>
module attributes {stable_mosaic.version = 11 : i64} {
  func.func @gcn_kernel(%arg0: i32, %arg1: i32, %arg2: memref<8x128xbf16, #tpu.memory_space<vmem>>, %arg3: memref<128x32xbf16, #tpu.memory_space<vmem>>, %arg4: memref<8x32xbf16, #tpu.memory_space<vmem>>, %arg5: memref<32x128xbf16, #tpu.memory_space<vmem>>, %arg6: memref<32x128xbf16, #tpu.memory_space<vmem>>, %arg7: memref<8x128xf32, #tpu.memory_space<vmem>>, %arg8: memref<8x32xf32, #tpu.memory_space<vmem>>) attributes {dimension_semantics = [#tpu.dimension_semantics<parallel>, #tpu.dimension_semantics<arbitrary>], iteration_bounds = array<i64: 2, 2>, scalar_prefetch = 0 : i64, scratch_operands = 1 : i64, tpu.core_type = #tpu.core_type<tc>, window_params = [{transform_indices = @transform_0, window_bounds = array<i64: 8, 128>}, {transform_indices = @transform_1, window_bounds = array<i64: 128, 32>}, {transform_indices = @transform_2, window_bounds = array<i64: 8, 32>}, {pipeline_mode = #tpu.pipeline_mode<synchronous>, transform_indices = @transform_3, window_bounds = array<i64: 32, 128>}, {pipeline_mode = #tpu.pipeline_mode<synchronous>, transform_indices = @transform_4, window_bounds = array<i64: 32, 128>}, {transform_indices = @transform_5, window_bounds = array<i64: 8, 128>}]} {
    %c0_i32 = arith.constant 0 : i32
    %0 = arith.cmpi eq, %arg1, %c0_i32 : i32
    %1 = arith.extui %0 : i1 to i32
    %c0_i32_0 = arith.constant 0 : i32
    %2 = arith.cmpi ne, %1, %c0_i32_0 : i32
    scf.if %2 {
      %c0_9 = arith.constant 0 : index
      %c0_10 = arith.constant 0 : index
      %12 = vector.load %arg4[%c0_9, %c0_10] : memref<8x32xbf16, #tpu.memory_space<vmem>>, vector<8x32xbf16>
      %c0_11 = arith.constant 0 : index
      %c0_12 = arith.constant 0 : index
      %13 = vector.load %arg5[%c0_11, %c0_12] : memref<32x128xbf16, #tpu.memory_space<vmem>>, vector<32x128xbf16>
      %cst_13 = arith.constant dense<0.000000e+00> : vector<8x128xf32>
      %14 = tpu.matmul %12, %13, %cst_13 {dimension_numbers = #tpu.dot_dimension_numbers<[1], [0], [0], [1], [0, 0, 1, 1], [], []>} : vector<8x32xbf16>, vector<32x128xbf16>, vector<8x128xf32> -> vector<8x128xf32>
      %c0_14 = arith.constant 0 : index
      %c0_15 = arith.constant 0 : index
      %15 = vector.load %arg7[%c0_14, %c0_15] : memref<8x128xf32, #tpu.memory_space<vmem>>, vector<8x128xf32>
      tpu.vector_store %arg7[%c0_14, %c0_15], %14 {strides = array<i32>} : memref<8x128xf32, #tpu.memory_space<vmem>>, vector<8x128xf32>,
      %cst_16 = arith.constant 0.000000e+00 : f32
      %16 = vector.broadcast %cst_16 : f32 to vector<8x32xf32>
      %c0_17 = arith.constant 0 : index
      %c0_18 = arith.constant 0 : index
      %17 = vector.load %arg8[%c0_17, %c0_18] : memref<8x32xf32, #tpu.memory_space<vmem>>, vector<8x32xf32>
      tpu.vector_store %arg8[%c0_17, %c0_18], %16 {strides = array<i32>} : memref<8x32xf32, #tpu.memory_space<vmem>>, vector<8x32xf32>,
    } else {
    }
    %c0 = arith.constant 0 : index
    %c0_1 = arith.constant 0 : index
    %3 = vector.load %arg8[%c0, %c0_1] : memref<8x32xf32, #tpu.memory_space<vmem>>, vector<8x32xf32>
    %c0_2 = arith.constant 0 : index
    %c0_3 = arith.constant 0 : index
    %4 = vector.load %arg2[%c0_2, %c0_3] : memref<8x128xbf16, #tpu.memory_space<vmem>>, vector<8x128xbf16>
    %c0_4 = arith.constant 0 : index
    %c0_5 = arith.constant 0 : index
    %5 = vector.load %arg3[%c0_4, %c0_5] : memref<128x32xbf16, #tpu.memory_space<vmem>>, vector<128x32xbf16>
    %cst = arith.constant dense<0.000000e+00> : vector<8x32xf32>
    %6 = tpu.matmul %4, %5, %cst {dimension_numbers = #tpu.dot_dimension_numbers<[1], [0], [0], [1], [0, 0, 1, 1], [], []>} : vector<8x128xbf16>, vector<128x32xbf16>, vector<8x32xf32> -> vector<8x32xf32>
    %7 = arith.addf %3, %6 : vector<8x32xf32>
    %c0_6 = arith.constant 0 : index
    %c0_7 = arith.constant 0 : index
    %8 = vector.load %arg8[%c0_6, %c0_7] : memref<8x32xf32, #tpu.memory_space<vmem>>, vector<8x32xf32>
    tpu.vector_store %arg8[%c0_6, %c0_7], %7 {strides = array<i32>} : memref<8x32xf32, #tpu.memory_space<vmem>>, vector<8x32xf32>,
    %c1_i32 = arith.constant 1 : i32
    %9 = arith.cmpi eq, %arg1, %c1_i32 : i32
    %10 = arith.extui %9 : i1 to i32
    %c0_i32_8 = arith.constant 0 : i32
    %11 = arith.cmpi ne, %10, %c0_i32_8 : i32
    scf.if %11 {
      %c0_9 = arith.constant 0 : index
      %c0_10 = arith.constant 0 : index
      %12 = vector.load %arg8[%c0_9, %c0_10] : memref<8x32xf32, #tpu.memory_space<vmem>>, vector<8x32xf32>
      %13 = arith.truncf %12 : vector<8x32xf32> to vector<8x32xbf16>
      %c0_11 = arith.constant 0 : index
      %c0_12 = arith.constant 0 : index
      %14 = vector.load %arg7[%c0_11, %c0_12] : memref<8x128xf32, #tpu.memory_space<vmem>>, vector<8x128xf32>
      %c0_13 = arith.constant 0 : index
      %c0_14 = arith.constant 0 : index
      %15 = vector.load %arg6[%c0_13, %c0_14] : memref<32x128xbf16, #tpu.memory_space<vmem>>, vector<32x128xbf16>
      %cst_15 = arith.constant dense<0.000000e+00> : vector<8x128xf32>
      %16 = tpu.matmul %13, %15, %cst_15 {dimension_numbers = #tpu.dot_dimension_numbers<[1], [0], [0], [1], [0, 0, 1, 1], [], []>} : vector<8x32xbf16>, vector<32x128xbf16>, vector<8x128xf32> -> vector<8x128xf32>
      %17 = arith.addf %14, %16 : vector<8x128xf32>
      %cst_16 = arith.constant 0.000000e+00 : f32
      %18 = vector.broadcast %cst_16 : f32 to vector<8x128xf32>
      %19 = arith.maximumf %17, %18 : vector<8x128xf32>
      %c0_17 = arith.constant 0 : index
      %c0_18 = arith.constant 0 : index
      %20 = vector.load %arg7[%c0_17, %c0_18] : memref<8x128xf32, #tpu.memory_space<vmem>>, vector<8x128xf32>
      tpu.vector_store %arg7[%c0_17, %c0_18], %19 {strides = array<i32>} : memref<8x128xf32, #tpu.memory_space<vmem>>, vector<8x128xf32>,
    } else {
    }
    return
  }
  func.func @transform_0(%arg0: i32, %arg1: i32) -> (i32, i32) {
    %c0_i32 = arith.constant 0 : i32
    return %arg0, %arg1 : i32, i32
  }
  func.func @transform_1(%arg0: i32, %arg1: i32) -> (i32, i32) {
    %c0_i32 = arith.constant 0 : i32
    %c0_i32_0 = arith.constant 0 : i32
    return %arg1, %c0_i32 : i32, i32
  }
  func.func @transform_2(%arg0: i32, %arg1: i32) -> (i32, i32) {
    %c0_i32 = arith.constant 0 : i32
    %c0_i32_0 = arith.constant 0 : i32
    return %arg0, %c0_i32 : i32, i32
  }
  func.func @transform_3(%arg0: i32, %arg1: i32) -> (i32, i32) {
    %c0_i32 = arith.constant 0 : i32
    %c0_i32_0 = arith.constant 0 : i32
    %c0_i32_1 = arith.constant 0 : i32
    return %c0_i32, %c0_i32_0 : i32, i32
  }
  func.func @transform_4(%arg0: i32, %arg1: i32) -> (i32, i32) {
    %c0_i32 = arith.constant 0 : i32
    %c0_i32_0 = arith.constant 0 : i32
    %c0_i32_1 = arith.constant 0 : i32
    return %c0_i32, %c0_i32_0 : i32, i32
  }
  func.func @transform_5(%arg0: i32, %arg1: i32) -> (i32, i32) {
    %c0_i32 = arith.constant 0 : i32
    %c0_i32_0 = arith.constant 0 : i32
    return %arg0, %c0_i32 : i32, i32
  }
}

</mosaic_0001>

<bundles_post_ra>
// kernel: tpu_custom_call.1
= control target key start
LH: loop header
LB: loop body
LE: loop exit
PB: predicated region body
PF: predicated region fallthrough
CT: control target
= control target key end

     0   :  { %10 = vsyncpa [#allocation4], 0  ;;  %s1007_s0 = inlined_call_operand.vmem [shape: bf16[16,256], index: 0, kind: input, shape index: {}]   ;;  %s1008_s1 = inlined_call_operand.vmem [shape: bf16[256,32], index: 1, kind: input, shape index: {}]   ;;  %s1009_s2 = inlined_call_operand.vmem [shape: bf16[16,32], index: 2, kind: input, shape index: {}]   ;;  %s1010_s3 = inlined_call_operand.vmem [shape: bf16[32,128], index: 3, kind: input, shape index: {}]   ;;  %s1011_s4 = inlined_call_operand.vmem [shape: bf16[32,128], index: 4, kind: input, shape index: {}]   ;;  %s1012_s5 = inlined_call_operand.hbm [shape: f32[16,128], index: 5, kind: output, shape index: {}]  }
   0x1   :  { %12 = vsyncpa [#allocation4 + $0x1], 0  ;;  %s844_s18 = smov 0   ;;  %s846_s19 = smov 0  }
   0x2   :  { %s848_s20 = smov 0   ;;  %s850_s21 = smov 0  }
   0x3   :  { %s852_s22 = smov 0   ;;  %s854_s23 = smov 0  }
   0x4   :  { %s856_s24 = smov 0   ;;  %s858_s25 = smov 0  }
   0x5 LB: > { %1019 = sst [smem:[#allocation6_spill]] %s791_s20  ;;  %s566_s26 = sadd.s32 4294967295, %s811_s25   ;;  %s811_s25 = sphi %s858_s25, %s18_s25   ;;  %s807_s24 = sphi %s856_s24, %s1035_s24   ;;  %s803_s23 = sphi %s854_s23, %s1034_s23   ;;  %s799_s22 = sphi %s852_s22, %s1033_s22   ;;  %s795_s21 = sphi %s850_s21, %s1032_s21   ;;  %s791_s20 = sphi %s848_s20, %s1031_s20   ;;  %s787_s19 = sphi %s846_s19, %s1037_s19   ;;  %s783_s18 = sphi %s844_s18, %s1036_s18  }
   0x6   : > { %1020 = sst [smem:[#allocation7_spill]] %s803_s23  ;;  %s567_s27 = sadd.s32 4294967294, %s811_s25  }
   0x7   : > { %1021 = sst [smem:[#allocation8_spill]] %s807_s24  ;;  %s27_s28 = sadd.s32 1, %s803_s23 }
   0x8   : > { %p28_p0 = scmp.ge.s32.totalorder %s27_s28, 2  ;;  %s30_s29 = sadd.s32 1, %s807_s24 }
   0x9   : > { %p169_p1 = scmp.ne.s32.totalorder %s791_s20, %s787_s19  ;;  %p170_p2 = scmp.eq.s32.totalorder %s566_s26, 3 }
   0xa   : > { %s1039_s28 = smov (%p28_p0, %s27_s28), 0  ;;  %s1041_s29 = smov (!%p28_p0, %s30_s29), %s807_s24 }
   0xb   : > { %1022 = sst [smem:[#allocation9_spill]] %s1039_s28  ;;  %p893_p3 = por %p170_p2, %p169_p1 }
   0xc   : > { %p175_p4 = scmp.ne.s32.totalorder %s787_s19, %s783_s18  ;;  %p32_p5 = scmp.ge.s32.totalorder %s1041_s29, 2 }
   0xd   : > { %p176_p6 = scmp.eq.s32.totalorder %s567_s27, 3  ;;  %p570_p7 = scmp.ge.s32.totalorder %s811_s25, 1 }
   0xe   : > { %p227_p8 = scmp.lt.s32.totalorder %s811_s25, 5  ;;  %s1043_s29 = smov (%p32_p5, %s1041_s29), 0 }
   0xf   : > { %1024 = sst [smem:[#allocation10_spill]] %s1043_s29  ;;  %p903_p9 = por %p176_p6, %p175_p4 }
  0x10   : > { %p228_p10 = pnand %p570_p7, %p227_p8  ;;  %s156_s7 = ssub.s32 %s807_s24, %s1043_s29 }
  0x11   : > { %s1025_s6 = scalar_select %p903_p9, 1, 0 }
  0x12   : > { %s159_s8 = sadd.s32 1, %s791_s20  ;;  %p157_p11 = scmp.eq.s32.totalorder %s156_s7, 0 }
  0x13   : > { %1026 = sst [smem:[#allocation11_spill]] %s1025_s6  ;;  %231 = sbr.rel (%p228_p10) target bundleno = 503 (0x1f7), region = 40 }
  0x14   : > { %s911_s9 = scalar_select %p157_p11, %s791_s20, %s159_s8  }
  0x15   : > { %s1015_s10 = sand.u32 (!%p228_p10), 1, %s787_s19   ;;  %p267_p12 = scmp.lt.s32.totalorder (!%p228_p10), %s799_s22, 1 }
  0x16   : > { %1027 = sst [smem:[#allocation12_spill]] %s911_s9  ;;  %s571_s11 = sshll.u32 (!%p228_p10), %s1015_s10, 3 }
  0x17   : > { %p269_p13 = scmp.lt.s32.totalorder (!%p228_p10), %s795_s21, 1  ;;  %s574_s12 = sshll.u32 (!%p228_p10), %s795_s21, 4 }
  0x18   : > { %s268_s13 = scalar_select %p267_p12, %s799_s22, 1 }
  0x19   : > { %s270_s14 = scalar_select %p269_p13, %s795_s21, 1 }
  0x1a   : > { %s572_s15 = sshll.u32 %s268_s13, 1  ;;  %p276_p0 = scmp.lt.s32.totalorder %s574_s12, 31 }
  0x1b   : > { %s272_s16 = sadd.s32 %s572_s15, %s270_s14  ;;  %s576_s17 = sshll.u32 %s268_s13, 2 }
  0x1c   : > { %s573_s26 = sshll.u32 %s272_s16, 2  ;;  %s284_s8 = scalar_lea.vmem %s1009_s2, %s576_s17 }
  0x1d   : > { %s927_s24 = scalar_lea.vmem %s1007_s0, %s573_s26  ;;  %s1045_s12 = smov (!%p276_p0, %s574_s12), 31 }
  0x1e   : > { %s575_s10 = sshll.u32 %s1045_s12, 2  ;;  %s934_s6 = scalar_lea.vmem [#allocation3], %s571_s11 }
  0x1f   : > { %s932_s20 = scalar_lea.vmem %s1008_s1, %s575_s10  ;;  %p577_p1 = scmp.ne.s32.totalorder %s795_s21, 0 }
  0x21   : > { %289 = sbr.rel (%p577_p1) target bundleno = 180 (0xb4), region = 44 }
  0x26   : > { %v634_v0 = vld [vmem:[%s1010_s3 + $0x8] sm:$0xff]  ;;  %vm307_vm0 = vcmask 261120   ;;  %v813_v1 = vmov 0.0   ;;  %v633_v2 = vld [vmem:[%s1010_s3] sm:$0xff] }
  0x27   : > { %325 = vst.msk [vmem:[#allocation2] sm:$0xff] %vm307_vm0, %v813_v1  ;;  %317 = vmatpush.bf16.msra.mxu0 %v634_v0  ;;  %v290_v3 = vld [vmem:[%s284_s8] sm:$0xf] }
  0x2b   : > { %318 = vmatpush.bf16.msra.mxu0 %v633_v2 }
  0x2e   : > { %586 = vmatmul.msk.bf16.vlgmr.msra.gmra.mxu0 %vm307_vm0, %v290_v3 }
  0xab   : > { %v320_v4 = vpop.f32.mrf.mxu0 }
  0xac   : > { %324 = vst [vmem:[%s934_s6] sm:$0xff] %v320_v4 }
  0xb3   : > { %v322_v5 = vpop.f32.mrf.mxu0 }
  0xb4 PF: > { %v642_v6 = vld [vmem:[%s932_s20 + $0x38] sm:$0xff]  ;;  %v641_v7 = vld [vmem:[%s932_s20 + $0x30] sm:$0xff]  ;;  %v640_v8 = vld [vmem:[%s932_s20 + $0x28] sm:$0xff]  ;;  %vm406_vm1 = vcmask 261120   ;;  %p619_p2 = scmp.ne.s32.totalorder %s795_s21, 1 }
  0xb5   : > { %392 = vmatpush.bf16.msra.mxu0 %v642_v6  ;;  %v639_v9 = vld [vmem:[%s932_s20 + $0x20] sm:$0xff]  ;;  %v638_v10 = vld [vmem:[%s932_s20 + $0x18] sm:$0xff]  ;;  %v637_v11 = vld [vmem:[%s932_s20 + $0x10] sm:$0xff] }
  0xb6   : > { %v636_v12 = vld [vmem:[%s932_s20 + $0x8] sm:$0xff]  ;;  %v635_v13 = vld [vmem:[%s932_s20] sm:$0xff] }
  0xb7   : > { %v327_v14 = vld [vmem:[%s927_s24] sm:$0xf] }
  0xb8   : > { %v326_v15 = vld [vmem:[#allocation2] sm:$0xff] }
  0xb9   : > { %393 = vmatpush.bf16.msra.mxu0 %v641_v7 }
  0xbd   : > { %394 = vmatpush.bf16.msra.mxu0 %v640_v8 }
  0xc1   : > { %395 = vmatpush.bf16.msra.mxu0 %v639_v9 }
  0xc5   : > { %396 = vmatpush.bf16.msra.mxu0 %v638_v10 }
  0xc9   : > { %397 = vmatpush.bf16.msra.mxu0 %v637_v11 }
  0xcd   : > { %398 = vmatpush.bf16.msra.mxu0 %v636_v12 }
  0xd1   : > { %399 = vmatpush.bf16.msra.mxu0 %v635_v13 }
  0xd4   : > { %400 = vmatmul.bf16.vlgmr.msra.gmra.mxu0 %v327_v14 }
 0x151   : > { %v401_v16 = vpop.f32.mrf.mxu0 }
 0x152   : > { %v405_v17 = vadd.f32 %v401_v16, %v326_v15 }
 0x154   : > { %407 = vst.msk [vmem:[#allocation2] sm:$0xff] %vm406_vm1, %v405_v17 }
 0x155   : > { %411 = sbr.rel (%p619_p2) target bundleno = 488 (0x1e8), region = 48 }
 0x159   : > { %v403_v18 = vpop.f32.mrf.mxu0 }
 0x15a   : > { %v644_v19 = vld [vmem:[%s1011_s4 + $0x8] sm:$0xff]  ;;  %v643_v20 = vld [vmem:[%s1011_s4] sm:$0xff] }
 0x15b   : > { %440 = vmatpush.bf16.msra.mxu0 %v644_v19  ;;  %v412_v21 = vld [vmem:[#allocation2] sm:$0xff]  ;;  %v414_v23 = vld [vmem:[%s934_s6] sm:$0xff] }
 0x15c   : > { %v413_v22 = vpack.c.bf16 %v412_v21, %v412_v21 }
 0x15f   : > { %441 = vmatpush.bf16.msra.mxu0 %v643_v20 }
 0x162   : > { %628 = vmatmul.msk.bf16.vlgmr.msra.gmra.mxu0 %vm406_vm1, %v413_v22 }
 0x1df   : > { %v443_v24 = vpop.f32.mrf.mxu0 }
 0x1e0   : > { %v447_v25 = vadd.f32 %v443_v24, %v414_v23 }
 0x1e2   : > { %v448_v26 = vmax.f32 %v447_v25, 0.0 }
 0x1e4   : > { %449 = vst [vmem:[%s934_s6] sm:$0xff] %v448_v26 }
 0x1e7   : > { %v445_v27 = vpop.f32.mrf.mxu0 }
 0x1e8 PF: > { %s630_s21 = sshll.u32 %s799_s22, 3  ;;  %s463_s15 = sshll.u32 %s934_s6, 4  ;;  %s464_s15 = int_to_ptr.vmem [resolvable:$true] %s463_s15 }
 0x1e9   : > { %s461_s12 = scalar_lea.hbm %s1012_s5, %s630_s21  ;;  %s1028_s17 = sand.u32 1, %s787_s19  }
 0x1ea   : > { %s465_s16 = sshll.u32 %s461_s12, 4  ;;  %s451_s26 = scalar_lea.sflag [#allocation4], %s1028_s17  ;;  %s466_s16 = int_to_ptr.hbm [resolvable:$true] %s465_s16 }
 0x1eb   : > { %s731_s27 = sshra.s32 %s466_s16, 4  ;;  %s737_s22 = scalar_lea.hbm %s1012_s5, 16  ;;  %s732_s27 = int_to_ptr.hbm [resolvable:$true] %s731_s27 }
 0x1ec   : > { %s733_s7 = scalar_lea.hbm %s732_s27, 8  ;;  %p738_p7 = scmp.lt.s32.totalorder %s732_s27, %s1012_s5 }
 0x1ed   : > { %p734_p4 = scmp.ne.s32.totalorder %s732_s27, %s733_s7  ;;  %p739_p8 = scmp.lt.s32.totalorder %s737_s22, %s733_s7 }
 0x1ef   : > { %p735_p5 = pnand %p734_p4, %p893_p3  ;;  %p740_p10 = por %p739_p8, %p738_p7 }
 0x1f1   : > { %p736_p6 = pneg %p735_p5 }
 0x1f3   : > { %p741_p11 = pnand %p740_p10, %p736_p6 }
 0x1f5   : > { %744 = shalt.err (!%p741_p11)
}
 0x1f6   : > { %645 = dma.vmem_to_hbm [thread:$0]  (%p893_p3), %s464_s15, 128, %s466_s16, %s451_s26  }
 0x1f7 PF: > { %p651_p12 = scmp.ge.s32.totalorder %s811_s25, 2  ;;  %s477_s29 = sand.u32 1, %s783_s18  }
 0x1f8   : > { %s478_s23 = scalar_lea.sflag [#allocation4], %s477_s29 }
 0x1f9   : > { %p648_p13 = pnand %p651_p12, %p903_p9 }
 0x1fb   : > { %p649_p0 = pneg %p648_p13 }
 0x1fd   : > { %778 = dma.done.wait (%p649_p0), %s478_s23, 128  }
 0x1fe   : > { %780 = vsyncadd (%p649_p0), %s478_s23, 4294967168  ;;  %s18_s25 = sadd.s32 1, %s811_s25   ;;  %s1030_s9 = sld [smem:[#allocation6_spill]] }
 0x1ff   : > { %p15_p1 = scmp.ge.s32.totalorder %s18_s25, 6   ;;  %s1031_s20 = sld [smem:[#allocation12_spill]] }
 0x200   : > { %s1032_s21 = sld [smem:[#allocation7_spill]]  ;;  %s1036_s18 = smov %s787_s19 }
 0x201   : > { %s1033_s22 = sld [smem:[#allocation8_spill]]  ;;  %17 = sbr.rel (!%p15_p1) target bundleno = 5 (0x5), region = 89 }
 0x202   : > { %s1034_s23 = sld [smem:[#allocation9_spill]] }
 0x203   : > { %s1035_s24 = sld [smem:[#allocation10_spill]] }
 0x204   : > { %s1037_s19 = smov %s1030_s9 }
 0x206   :  { %484 = vsyncpa [#allocation4], 1 }
 0x207   :  { %486 = vsyncpa [#allocation4 + $0x1], 1 }

</bundles_post_ra>
